<compile_context>
chip_gen: v7x
topology: tpu7x:2x2x1
jax: 0.10.0
libtpu: 0.0.40
codegen_flags: <defaults>
</compile_context>

<pallas_src>
import functools

import jax
import jax.numpy as jnp
from jax import lax
from jax.experimental import pallas as pl
from jax.experimental.pallas import tpu as pltpu

_LN_EPS = 1e-5  # PyTorch nn.LayerNorm default


def _prenorm_linear_kernel(x_ref, g_ref, beta_ref, w_ref, b_ref, o_ref, *, eps):
    # ---- LayerNorm over the feature dim, computed in f32 (safe on v5e too) ----
    x = x_ref[...].astype(jnp.float32)                         # (TM, H_in)
    mean = jnp.mean(x, axis=-1, keepdims=True)                  # XLU reduce
    xc = x - mean
    var = jnp.mean(xc * xc, axis=-1, keepdims=True)
    inv = lax.rsqrt(var + eps)                                  # EUP (free slot)
    xn = xc * inv * g_ref[...] + beta_ref[...]                  # (1, H_in) broadcast

    # ---- fn(x) = x @ W + b on the MXU (bf16/f32 operands, f32 accumulation) ----
    y = jnp.dot(xn.astype(w_ref.dtype), w_ref[...],
                preferred_element_type=jnp.float32)             # (TM, H_out_p)
    y = y + b_ref[...]                                          # f32 epilogue
    o_ref[...] = y.astype(o_ref.dtype)


def _round_up(v, m):
    return (v + m - 1) // m * m


def _pick_row_tile(m_rows, h_in, h_out_p, x_bytes, w_bytes,
                   vmem_budget=24 * 1024 * 1024):
    """Largest row tile whose double-buffered footprint fits a conservative
    VMEM budget (safe under v7x's 32 MiB scoped default / 64 MiB physical)."""
    # resident params: weight tile + bias + gamma/beta (f32)
    fixed = h_in * h_out_p * w_bytes + (h_out_p + 2 * h_in) * 4
    # per row: double-buffered input & output tiles + ~2 f32 temporaries
    per_row = 2 * (h_in * x_bytes + h_out_p * 4) + 2 * h_in * 4
    tm = max(8, (vmem_budget - fixed) // max(per_row, 1))
    tm = min(512, tm)
    if tm >= 256:
        tm = (tm // 256) * 256        # match v7x 2x256x256 MXU geometry
    else:
        tm = (tm // 8) * 8            # (8,128) sublane constraint
    return int(min(tm, _round_up(m_rows, 8)))


def prenorm_linear(x, gamma, beta, w, b, *, eps=_LN_EPS,
                   compute_dtype=jnp.bfloat16):
    """PreNorm(dim, fn=Linear(w, b)) forward: fn(LayerNorm(x)).

    x: (B, T, H_in)   gamma, beta: (H_in,)   w: (H_in, H_out)   b: (H_out,)
    """
    B, T, H_in = x.shape
    H_out = w.shape[1]
    out_dtype = x.dtype

    M = B * T
    # Lane-dense output: pad H_out up to a multiple of 128 (zero cols / bias).
    H_out_p = _round_up(H_out, 128)

    x_bytes = jnp.dtype(compute_dtype).itemsize
    TM = _pick_row_tile(M, H_in, H_out_p, x_bytes, x_bytes)
    M_p = _round_up(M, TM)

    x2d = x.reshape(M, H_in).astype(compute_dtype)
    if M_p != M:
        # Zero rows normalize to `beta` then matmul -> finite garbage, sliced off below.
        x2d = jnp.pad(x2d, ((0, M_p - M), (0, 0)))
    w_p = w.astype(compute_dtype)
    b_p = b.astype(jnp.float32)
    if H_out_p != H_out:
        w_p = jnp.pad(w_p, ((0, 0), (0, H_out_p - H_out)))
        b_p = jnp.pad(b_p, ((0, H_out_p - H_out),))
    g2d = gamma.astype(jnp.float32).reshape(1, H_in)
    beta2d = beta.astype(jnp.float32).reshape(1, H_in)
    b2d = b_p.reshape(1, H_out_p)

    cost = pl.CostEstimate(
        flops=2 * M_p * H_in * H_out_p + 10 * M_p * H_in,
        transcendentals=M_p,
        bytes_accessed=(M_p * H_in * x_bytes + H_in * H_out_p * x_bytes
                        + (H_out_p + 2 * H_in) * 4
                        + M_p * H_out_p * jnp.dtype(out_dtype).itemsize),
    )

    # TODO(synk): for very large H_in / H_out (big FF expansion), add a K / N
    # grid axis with a VMEM f32 accumulator + pl.when init/finalize instead of
    # keeping the whole (H_in, H_out) weight resident.
    out2d = pl.pallas_call(
        functools.partial(_prenorm_linear_kernel, eps=eps),
        out_shape=jax.ShapeDtypeStruct((M_p, H_out_p), out_dtype),
        grid=(M_p // TM,),
        in_specs=[
            pl.BlockSpec((TM, H_in), lambda i: (i, 0)),        # x row tile (pipelined)
            pl.BlockSpec((1, H_in), lambda i: (0, 0)),         # gamma (resident)
            pl.BlockSpec((1, H_in), lambda i: (0, 0)),         # beta  (resident)
            pl.BlockSpec((H_in, H_out_p), lambda i: (0, 0)),   # W     (resident)
            pl.BlockSpec((1, H_out_p), lambda i: (0, 0)),      # b     (resident)
        ],
        out_specs=pl.BlockSpec((TM, H_out_p), lambda i: (i, 0)),
        compiler_params=pltpu.CompilerParams(
            dimension_semantics=("parallel",),                 # shard row tiles across TCs
        ),
        cost_estimate=cost,
    )(x2d, g2d, beta2d, w_p, b2d)

    return out2d[:M, :H_out].reshape(B, T, H_out)


def prenorm_linear_ref(x, gamma, beta, w, b, eps=_LN_EPS):
    """Pure-JAX f32 reference: LayerNorm(x) @ W + b."""
    mean = jnp.mean(x, axis=-1, keepdims=True)
    var = jnp.mean((x - mean) ** 2, axis=-1, keepdims=True)
    xn = (x - mean) * lax.rsqrt(var + eps) * gamma + beta
    return jnp.einsum("bth,hk->btk", xn, w) + b


if __name__ == "__main__":
    key = jax.random.PRNGKey(0)
    kx, kw, kb, kg, kbe = jax.random.split(key, 5)

    B, T, H = 2, 8, 32  # small demo shapes; dim = H for both LayerNorm and Linear

    x = jax.random.normal(kx, (B, T, H), dtype=jnp.float32)
    w = jax.random.normal(kw, (H, H), dtype=jnp.float32) * (1.0 / jnp.sqrt(H))
    b = jax.random.normal(kb, (H,), dtype=jnp.float32) * 0.01
    gamma = 1.0 + 0.1 * jax.random.normal(kg, (H,), dtype=jnp.float32)
    beta = 0.1 * jax.random.normal(kbe, (H,), dtype=jnp.float32)

    ref = prenorm_linear_ref(x, gamma, beta, w, b)

    # f32-operand path: tight correctness check.
    out_f32 = prenorm_linear(x, gamma, beta, w, b, compute_dtype=jnp.float32)
    jax.block_until_ready(out_f32)
    assert jnp.allclose(out_f32, ref, atol=2e-4, rtol=2e-4), "f32 path mismatch"

    # Default bf16-operand path (f32 accumulation): looser tolerance.
    out_bf16 = prenorm_linear(x, gamma, beta, w, b)
    jax.block_until_ready(out_bf16)
    assert jnp.allclose(out_bf16, ref, atol=5e-2, rtol=5e-2), "bf16 path mismatch"

    print("KERNEL_OK")
</pallas_src>

<mosaic_0001>
module attributes {stable_mosaic.version = 11 : i64} {
  func.func @_prenorm_linear_kernel(%arg0: i32, %arg1: memref<16x32xf32, #tpu.memory_space<vmem>>, %arg2: memref<1x32xf32, #tpu.memory_space<vmem>>, %arg3: memref<1x32xf32, #tpu.memory_space<vmem>>, %arg4: memref<32x128xf32, #tpu.memory_space<vmem>>, %arg5: memref<1x128xf32, #tpu.memory_space<vmem>>, %arg6: memref<16x128xf32, #tpu.memory_space<vmem>>) attributes {dimension_semantics = [#tpu.dimension_semantics<parallel>], iteration_bounds = array<i64: 1>, scalar_prefetch = 0 : i64, scratch_operands = 0 : i64, tpu.core_type = #tpu.core_type<tc>, window_params = [{transform_indices = @transform_0, window_bounds = array<i64: 16, 32>}, {pipeline_mode = #tpu.pipeline_mode<synchronous>, transform_indices = @transform_1, window_bounds = array<i64: 1, 32>}, {pipeline_mode = #tpu.pipeline_mode<synchronous>, transform_indices = @transform_2, window_bounds = array<i64: 1, 32>}, {pipeline_mode = #tpu.pipeline_mode<synchronous>, transform_indices = @transform_3, window_bounds = array<i64: 32, 128>}, {pipeline_mode = #tpu.pipeline_mode<synchronous>, transform_indices = @transform_4, window_bounds = array<i64: 1, 128>}, {transform_indices = @transform_5, window_bounds = array<i64: 16, 128>}]} {
    %c0 = arith.constant 0 : index
    %c0_0 = arith.constant 0 : index
    %0 = vector.load %arg1[%c0, %c0_0] : memref<16x32xf32, #tpu.memory_space<vmem>>, vector<16x32xf32>
    %cst = arith.constant dense<0.000000e+00> : vector<16xf32>
    %1 = vector.multi_reduction <add>, %0, %cst [1] : vector<16x32xf32> to vector<16xf32>
    %2 = vector.shape_cast %1 : vector<16xf32> to vector<16x1xf32>
    %cst_1 = arith.constant 3.200000e+01 : f32
    %3 = vector.broadcast %cst_1 : f32 to vector<16x1xf32>
    %4 = arith.divf %2, %3 : vector<16x1xf32>
    %5 = vector.broadcast %4 : vector<16x1xf32> to vector<16x32xf32>
    %6 = arith.subf %0, %5 : vector<16x32xf32>
    %7 = arith.mulf %6, %6 : vector<16x32xf32>
    %cst_2 = arith.constant dense<0.000000e+00> : vector<16xf32>
    %8 = vector.multi_reduction <add>, %7, %cst_2 [1] : vector<16x32xf32> to vector<16xf32>
    %9 = vector.shape_cast %8 : vector<16xf32> to vector<16x1xf32>
    %cst_3 = arith.constant 3.200000e+01 : f32
    %10 = vector.broadcast %cst_3 : f32 to vector<16x1xf32>
    %11 = arith.divf %9, %10 : vector<16x1xf32>
    %cst_4 = arith.constant 9.99999974E-6 : f32
    %12 = vector.broadcast %cst_4 : f32 to vector<16x1xf32>
    %13 = arith.addf %11, %12 : vector<16x1xf32>
    %14 = math.rsqrt %13 : vector<16x1xf32>
    %15 = vector.broadcast %14 : vector<16x1xf32> to vector<16x32xf32>
    %16 = arith.mulf %6, %15 : vector<16x32xf32>
    %c0_5 = arith.constant 0 : index
    %c0_6 = arith.constant 0 : index
    %17 = vector.load %arg2[%c0_5, %c0_6] : memref<1x32xf32, #tpu.memory_space<vmem>>, vector<1x32xf32>
    %18 = vector.broadcast %17 : vector<1x32xf32> to vector<16x32xf32>
    %19 = arith.mulf %16, %18 : vector<16x32xf32>
    %c0_7 = arith.constant 0 : index
    %c0_8 = arith.constant 0 : index
    %20 = vector.load %arg3[%c0_7, %c0_8] : memref<1x32xf32, #tpu.memory_space<vmem>>, vector<1x32xf32>
    %21 = vector.broadcast %20 : vector<1x32xf32> to vector<16x32xf32>
    %22 = arith.addf %19, %21 : vector<16x32xf32>
    %c0_9 = arith.constant 0 : index
    %c0_10 = arith.constant 0 : index
    %23 = vector.load %arg4[%c0_9, %c0_10] : memref<32x128xf32, #tpu.memory_space<vmem>>, vector<32x128xf32>
    %cst_11 = arith.constant dense<0.000000e+00> : vector<16x128xf32>
    %24 = tpu.matmul %22, %23, %cst_11 {dimension_numbers = #tpu.dot_dimension_numbers<[1], [0], [0], [1], [0, 0, 1, 1], [], []>} : vector<16x32xf32>, vector<32x128xf32>, vector<16x128xf32> -> vector<16x128xf32>
    %c0_12 = arith.constant 0 : index
    %c0_13 = arith.constant 0 : index
    %25 = vector.load %arg5[%c0_12, %c0_13] : memref<1x128xf32, #tpu.memory_space<vmem>>, vector<1x128xf32>
    %26 = vector.broadcast %25 : vector<1x128xf32> to vector<16x128xf32>
    %27 = arith.addf %24, %26 : vector<16x128xf32>
    %c0_14 = arith.constant 0 : index
    %c0_15 = arith.constant 0 : index
    %28 = vector.load %arg6[%c0_14, %c0_15] : memref<16x128xf32, #tpu.memory_space<vmem>>, vector<16x128xf32>
    tpu.vector_store %arg6[%c0_14, %c0_15], %27 {strides = array<i32>} : memref<16x128xf32, #tpu.memory_space<vmem>>, vector<16x128xf32>,
    return
  }
  func.func @transform_0(%arg0: i32) -> (i32, i32) {
    %c0_i32 = arith.constant 0 : i32
    %c0_i32_0 = arith.constant 0 : i32
    return %arg0, %c0_i32 : i32, i32
  }
  func.func @transform_1(%arg0: i32) -> (i32, i32) {
    %c0_i32 = arith.constant 0 : i32
    %c0_i32_0 = arith.constant 0 : i32
    %c0_i32_1 = arith.constant 0 : i32
    return %c0_i32, %c0_i32_0 : i32, i32
  }
  func.func @transform_2(%arg0: i32) -> (i32, i32) {
    %c0_i32 = arith.constant 0 : i32
    %c0_i32_0 = arith.constant 0 : i32
    %c0_i32_1 = arith.constant 0 : i32
    return %c0_i32, %c0_i32_0 : i32, i32
  }
  func.func @transform_3(%arg0: i32) -> (i32, i32) {
    %c0_i32 = arith.constant 0 : i32
    %c0_i32_0 = arith.constant 0 : i32
    %c0_i32_1 = arith.constant 0 : i32
    return %c0_i32, %c0_i32_0 : i32, i32
  }
  func.func @transform_4(%arg0: i32) -> (i32, i32) {
    %c0_i32 = arith.constant 0 : i32
    %c0_i32_0 = arith.constant 0 : i32
    %c0_i32_1 = arith.constant 0 : i32
    return %c0_i32, %c0_i32_0 : i32, i32
  }
  func.func @transform_5(%arg0: i32) -> (i32, i32) {
    %c0_i32 = arith.constant 0 : i32
    %c0_i32_0 = arith.constant 0 : i32
    return %arg0, %c0_i32 : i32, i32
  }
}

</mosaic_0001>

<bundles_post_ra>
// kernel: tpu_custom_call.1
= control target key start
LH: loop header
LB: loop body
LE: loop exit
PB: predicated region body
PF: predicated region fallthrough
CT: control target
= control target key end

     0   :  { %10 = vsyncpa [#allocation3], 0  ;;  %s415_s0 = inlined_call_operand.hbm [shape: f32[16,32], index: 0, kind: input, shape index: {}]   ;;  %s416_s1 = inlined_call_operand.vmem [shape: f32[1,32], index: 1, kind: input, shape index: {}]   ;;  %s417_s2 = inlined_call_operand.vmem [shape: f32[1,32], index: 2, kind: input, shape index: {}]   ;;  %s418_s3 = inlined_call_operand.hbm [shape: f32[32,128], index: 3, kind: input, shape index: {}]   ;;  %s419_s4 = inlined_call_operand.vmem [shape: f32[1,128], index: 4, kind: input, shape index: {}]   ;;  %s420_s5 = inlined_call_operand.hbm [shape: f32[16,128], index: 5, kind: output, shape index: {}]  }
   0x1   :  { %11 = vsyncpa [#allocation6], 0 }
   0x2   :  { %12 = vsyncpa [#allocation4], 0  ;;  %s320_s18 = smov [#allocation2]   ;;  %s248_s22 = scalar_lea.hbm %s415_s0, 256 }
   0x3   :  { %s18_s19 = sshll.u32 %s320_s18, 4  ;;  %p249_p0 = scmp.ne.s32.totalorder %s415_s0, %s248_s22  ;;  %s19_s19 = int_to_ptr.vmem [resolvable:$true] %s18_s19 }
   0x4   :  { %p252_p1 = scmp.lt.u32.totalorder %s248_s22, %s415_s0 }
   0x6   :  { %p254_p2 = pnand %p252_p1, %p249_p0 }
   0x8   :  { %257 = shalt.err (!%p254_p2)
}
   0x9   :  { %s258_s27 = scalar_lea.vmem %s19_s19, 256  ;;  %p263_p4 = scmp.lt.s32.totalorder %s19_s19, %s19_s19 }
   0xa   :  { %p259_p3 = scmp.ne.s32.totalorder %s19_s19, %s258_s27  ;;  %p264_p5 = scmp.lt.s32.totalorder %s258_s27, %s258_s27 }
   0xc   :  { %p265_p6 = por %p264_p5, %p263_p4 }
   0xe   :  { %p266_p7 = pnand %p265_p6, %p259_p3 }
  0x10   :  { %269 = shalt.err (!%p266_p7)
}
  0x11   :  { %s321_s28 = smov 128   ;;  %s322_s29 = smov 8  }
  0x12   :  { %24 = dma.hbm_to_vmem [thread:$0]  %s415_s0, 256, %s19_s19, [#allocation3], %s321_s28, %s321_s28, %s322_s29  }
  0x13   :  { %s323_s7 = smov [#allocation5]   ;;  %s270_s11 = scalar_lea.hbm %s418_s3, 512 }
  0x14   :  { %s34_s8 = sshll.u32 %s323_s7, 4  ;;  %p271_p8 = scmp.ne.s32.totalorder %s418_s3, %s270_s11  ;;  %s35_s8 = int_to_ptr.vmem [resolvable:$true] %s34_s8 }
  0x15   :  { %p274_p9 = scmp.lt.u32.totalorder %s270_s11, %s418_s3 }
  0x17   :  { %p276_p10 = pnand %p274_p9, %p271_p8 }
  0x19   :  { %279 = shalt.err (!%p276_p10)
}
  0x1a   :  { %s280_s16 = scalar_lea.vmem %s35_s8, 512  ;;  %p285_p12 = scmp.lt.s32.totalorder %s35_s8, %s35_s8 }
  0x1b   :  { %p281_p11 = scmp.ne.s32.totalorder %s35_s8, %s280_s16  ;;  %p286_p13 = scmp.lt.s32.totalorder %s280_s16, %s280_s16 }
  0x1d   :  { %p287_p0 = por %p286_p13, %p285_p12 }
  0x1f   :  { %p288_p1 = pnand %p287_p0, %p281_p11 }
  0x21   :  { %291 = shalt.err (!%p288_p1)
}
  0x22   :  { %40 = dma.hbm_to_vmem [thread:$0]  %s418_s3, 512, %s35_s8, [#allocation6], %s321_s28, %s321_s28, %s322_s29  }
  0x23   :  { %314 = dma.done.wait [#allocation3], 256  }
  0x24   :  { %315 = vsyncadd [#allocation3], 4294967040 }
  0x25   :  { %316 = dma.done.wait [#allocation6], 512  }
  0x26   :  { %317 = vsyncadd [#allocation6], 4294966784  ;;  %vm51_vm0 = vcmask 261120   ;;  %v49_v0 = vld [vmem:[#allocation2] sm:$0xff]  ;;  %v50_v1 = vld [vmem:[#allocation2 + $0x8] sm:$0xff] }
  0x27   :  { %v52_v2 = vsel %vm51_vm0, %v49_v0, 0.0  ;;  %v55_v3 = vsel %vm51_vm0, %v50_v1, 0.0  ;;  %v97_v14 = vld [vmem:[#allocation5] sm:$0xff]  ;;  %v98_v15 = vld [vmem:[#allocation5 + $0x8] sm:$0xff]  ;;  %v99_v16 = vld [vmem:[#allocation5 + $0x10] sm:$0xff] }
  0x28   :  { %53 = vadd.xlane.f32.xlu0 %v52_v2  ;;  %v231_v17 = vpack.c.bf16 %v98_v15, %v97_v14  ;;  %v100_v18 = vld [vmem:[#allocation5 + $0x18] sm:$0xff]  ;;  %v209_v27 = vld [vmem:[%s416_s1] ss:$0 sm:$0xff]  ;;  %s324_s1 = smov [#allocation7]  }
  0x29   :  { %v235_v19 = vpack.c.bf16 %v100_v18, %v99_v16  ;;  %v210_v29 = vld [vmem:[%s417_s2] ss:$0 sm:$0xff]  ;;  %s196_s23 = sshll.u32 %s324_s1, 4  ;;  %s197_s23 = int_to_ptr.vmem [resolvable:$true] %s196_s23 }
  0x2a   :  { %232 = vmatprep.subr.bf16.mxu0 %v231_v17  ;;  %v211_v36 = vld [vmem:[%s419_s4] ss:$0 sm:$0xff]  ;;  %s292_s2 = scalar_lea.vmem %s197_s23, 256  ;;  %p297_p3 = scmp.lt.s32.totalorder %s197_s23, %s197_s23 }
  0x2b   :  { %234 = vmatpush3.bf16.msra.mxu0 %v231_v17  ;;  %p293_p2 = scmp.ne.s32.totalorder %s197_s23, %s292_s2  ;;  %p298_p4 = scmp.lt.s32.totalorder %s292_s2, %s292_s2 }
  0x2c   :  { %56 = vadd.xlane.f32.xlu0 %v55_v3  ;;  %236 = vmatprep.subr.bf16.mxu0 %v235_v19 }
  0x2d   :  { %p299_p5 = por %p298_p4, %p297_p3 }
  0x2f   :  { %238 = vmatpush3.bf16.msra.mxu0 %v235_v19  ;;  %p300_p6 = pnand %p299_p5, %p293_p2 }
  0xb5   :  { %v54_v4 = vpop.xlane.xlu0 %53 }
  0xb6   :  { %v59_v5 = vmul.f32 0.03125, %v54_v4 }
  0xb8   :  { %v61_v6 = vsub.f32 %v49_v0, %v59_v5 }
  0xb9   :  { %v57_v7 = vpop.xlane.xlu0 %56 }
  0xba   :  { %v60_v8 = vmul.f32 0.03125, %v57_v7  ;;  %v63_v9 = vmul.f32 %v61_v6, %v61_v6 }
  0xbc   :  { %v62_v10 = vsub.f32 %v50_v1, %v60_v8  ;;  %v65_v11 = vsel %vm51_vm0, %v63_v9, 0.0 }
  0xbd   :  { %66 = vadd.xlane.f32.xlu1 %v65_v11 }
  0xbe   :  { %v64_v12 = vmul.f32 %v62_v10, %v62_v10 }
  0xc0   :  { %v68_v13 = vsel %vm51_vm0, %v64_v12, 0.0 }
  0xc1   :  { %69 = vadd.xlane.f32.xlu1 %v68_v13 }
 0x14a   :  { %v67_v20 = vpop.xlane.xlu1 %66 }
 0x14b   :  { %v71_v21 = vmul.f32 0.03125, %v67_v20 }
 0x14d   :  { %v73_v22 = vadd.f32 1e-05, %v71_v21 }
 0x14e   :  { %v70_v23 = vpop.xlane.xlu1 %69 }
 0x14f   :  { %244 = vrsqrt.f32 %v73_v22  ;;  %v72_v24 = vmul.f32 0.03125, %v70_v23 }
 0x151   :  { %v74_v25 = vadd.f32 1e-05, %v72_v24 }
 0x153   :  { %246 = vrsqrt.f32 %v74_v25 }
 0x159   :  { %v245_v26 = vpop.eup %244 }
 0x15a   :  { %v77_v28 = vmul.f32 %v245_v26, %v61_v6 }
 0x15c   :  { %v86_v30 = vmul.f32 %v209_v27, %v77_v28 }
 0x15d   :  { %v247_v31 = vpop.eup %246 }
 0x15e   :  { %v78_v32 = vmul.f32 %v247_v31, %v62_v10  ;;  %v95_v33 = vadd.f32 %v210_v29, %v86_v30 }
 0x160   :  { %v87_v34 = vmul.f32 %v209_v27, %v78_v32  ;;  %228 = vmatprep.mubr.msk.f32.mxu0 %vm51_vm0, %v95_v33 }
 0x162   :  { %v96_v35 = vadd.f32 %v210_v29, %v87_v34 }
 0x164   :  { %229 = vmatmul.mubr.msk.f32.vlgmr.msra.gmra.mrb[0].mxu0 %vm51_vm0, %v96_v35 }
 0x237   :  { %v230_v37 = vpop.f32.mrb[0].mxu0 }
 0x238   :  { %v186_v38 = vadd.f32 %v230_v37, %v211_v36  ;;  %v180_v39 = vpop.f32.mrb[1].mxu0 }
 0x239   :  { %v181_v40 = vadd.f32 %v211_v36, %v180_v39 }
 0x23a   :  { %190 = vst [vmem:[#allocation7 + $0x8] sm:$0xff] %v186_v38 }
 0x23b   :  { %189 = vst [vmem:[#allocation7] sm:$0xff] %v181_v40 }
 0x23c   :  { %303 = shalt.err (!%p300_p6)
}
 0x23d   :  { %s304_s4 = scalar_lea.hbm %s420_s5, 256 }
 0x23e   :  { %p305_p7 = scmp.ne.s32.totalorder %s420_s5, %s304_s4  ;;  %p308_p8 = scmp.lt.u32.totalorder %s304_s4, %s420_s5 }
 0x240   :  { %p310_p9 = pnand %p308_p8, %p305_p7 }
 0x242   :  { %313 = shalt.err (!%p310_p9)
}
 0x243   :  { %202 = dma.vmem_to_hbm [thread:$0]  %s197_s23, 256, %s420_s5, [#allocation4], %s321_s28, %s321_s28, %s322_s29  }
 0x244   :  { %318 = dma.done.wait [#allocation4], 256  }
 0x245   :  { %319 = vsyncadd [#allocation4], 4294967040 }
 0x246   :  { %206 = vsyncpa [#allocation3], 1 }
 0x247   :  { %207 = vsyncpa [#allocation6], 1 }
 0x248   :  { %208 = vsyncpa [#allocation4], 1 }

</bundles_post_ra>
